<compile_context>
chip_gen: v5e
topology: v5e:2x2
jax: 0.10.0
libtpu: 0.0.40
codegen_flags: <defaults>
</compile_context>

<pallas_src>
import functools

import jax
import jax.numpy as jnp
from jax import lax
from jax.experimental import pallas as pl
from jax.experimental.pallas import tpu as pltpu


def _cdiv(a, b):
    return (a + b - 1) // b


def _tpu_hw():
    """Best-effort (VMEM capacity, TensorCores-per-chip) query.

    Falls back to the most conservative legal values (64 MiB, 1 core) if the
    introspection API is unavailable, which stays correct on every generation.
    """
    vmem_capacity = 64 * 1024 * 1024
    num_cores = 1
    try:
        info = pltpu.get_tpu_info()
        vmem_capacity = int(getattr(info, "vmem_capacity_bytes", vmem_capacity))
        for name in ("num_cores", "tensorcore_count", "num_tensorcores",
                     "cores_per_chip", "num_cores_per_chip"):
            v = getattr(info, name, None)
            if v:
                num_cores = int(v)
                break
    except Exception:
        pass
    if num_cores <= 1:
        try:
            if "v7" in jax.devices()[0].device_kind.lower():
                num_cores = 2
        except Exception:
            pass
    # Only TC-per-chip sharding makes sense for the parallel axis; cap at 2.
    return vmem_capacity, max(1, min(num_cores, 2))


def _focal_loss_kernel(x_ref, t_ref, out_ref, *, gamma, n_rows, tile_n,
                       tiles_per_shard):
    p = pl.program_id(0)
    t = pl.program_id(1)
    # Un-clamped logical tile start (used for the validity mask / skip guard).
    row_start = (p * tiles_per_shard + t) * tile_n

    @pl.when(t == 0)
    def _init():
        out_ref[...] = jnp.zeros_like(out_ref)

    # Fully out-of-range (clamped duplicate) tiles skip all compute; only the
    # accumulator init above runs for them.
    @pl.when(row_start < n_rows)
    def _compute():
        x = x_ref[...].astype(jnp.float32)                     # (tile_n, C)
        c = x.shape[-1]
        tgt = t_ref[...]                                       # (tile_n, 1)

        # Target gather fused into log-softmax, on the *raw* logits so the
        # compare/select/sum is independent of the max/exp/log chain.
        col_ids = lax.broadcasted_iota(jnp.int32, (1, c), 1)   # (1, C)
        sel_sum = jnp.sum(jnp.where(col_ids == tgt, x, 0.0),
                          axis=-1, keepdims=True)              # (tile_n, 1)

        row_max = jnp.max(x, axis=-1, keepdims=True)           # (tile_n, 1)
        lse = jnp.log(jnp.sum(jnp.exp(x - row_max), axis=-1, keepdims=True))
        logpt = sel_sum - row_max - lse                        # (tile_n, 1)

        # Statically specialize the focal factor on gamma (a Python float).
        if gamma == 0.0:
            loss = -logpt
        else:
            pt = jnp.exp(logpt)
            # Clamp: fp rounding can give pt marginally > 1 when the target
            # class dominates; w**gamma would then be NaN for non-int gamma.
            w = jnp.maximum(1.0 - pt, 0.0)
            if float(gamma).is_integer() and 1.0 <= gamma <= 4.0:
                f = w
                for _ in range(int(gamma) - 1):
                    f = f * w
            else:
                f = w ** gamma  # generic fallback (EUP log/exp pair)
            loss = -f * logpt

        # Mask padded rows of a ragged last tile; jnp.where keeps any NaN from
        # garbage pad rows out of the reduction.
        row_ids = row_start + lax.broadcasted_iota(jnp.int32, (tile_n, 1), 0)
        loss = jnp.where(row_ids < n_rows, loss, 0.0)

        # Broadcast-add the shard partial sum into the lane-dense (1, 8, 128)
        # accumulator block (full unmasked vector stores).
        out_ref[...] += jnp.sum(loss, axis=0, keepdims=True)


def focal_loss(logits, target, *, gamma=0.0, size_average=True, tile_n=None,
               num_shards=None):
    """Pallas TPU implementation of FocalLoss.forward.

    logits: (N, C) float array
    target: (N,) int array of class indices
    returns: scalar float32 (mean if size_average else sum)
    """
    n, c = logits.shape
    target2d = target.reshape(n, 1).astype(jnp.int32)
    itemsize = jnp.dtype(logits.dtype).itemsize
    # Sublane packing: 8 rows for f32, 16 for bf16, 32 for int8/fp8.
    sublane = max(8, 32 // itemsize)

    vmem_capacity, num_cores = _tpu_hw()
    small_vmem = vmem_capacity <= 64 * 1024 * 1024  # v7x (or unknown) per-TC

    if tile_n is None:
        # ~4 MiB logits block on 64-MiB parts, ~8 MiB on 128-MiB parts; the
        # tiled-streaming roofline plateaus well below either, so no HBM
        # efficiency is lost while leaving headroom for intermediates.
        budget = (4 if small_vmem else 8) * 1024 * 1024
        max_rows = max(sublane, budget // max(1, c * itemsize))
        tile_n = min(n, 1024, max_rows)
    else:
        tile_n = min(int(tile_n), n)
    if tile_n < n:
        tile_n = max(sublane, (tile_n // sublane) * sublane)
        if tile_n >= n:
            tile_n = n  # full-extent block is always legal

    num_tiles = _cdiv(n, tile_n)
    # Outer "parallel" shard axis: splits rows across TCs only where there is
    # more than one TensorCore (v7x); single-TC chips use one even shard.
    if num_shards is None:
        num_shards = num_cores
    num_shards = max(1, min(int(num_shards), 2, num_tiles))
    tiles_per_shard = _cdiv(num_tiles, num_shards)

    def _block_idx(p, t):
        # Clamp the (at most one) overhanging tile of the last shard; its
        # compute is skipped entirely inside the kernel.
        return jnp.minimum(p * tiles_per_shard + t, num_tiles - 1)

    kernel = functools.partial(
        _focal_loss_kernel,
        gamma=float(gamma),
        n_rows=n,
        tile_n=tile_n,
        tiles_per_shard=tiles_per_shard,
    )

    tile_bytes = tile_n * c * itemsize
    # Rough need: 2x double-buffered logits + padded target blocks + a few
    # full-tile f32 intermediates + slack.  Clamp to <= 3/4 of physical VMEM
    # (v7x: 48 MiB cap), never the previous 96 MiB hard cap.
    need = 6 * tile_bytes + 2 * tile_n * 512 + 4 * 1024 * 1024
    cap = min(96 * 1024 * 1024, (vmem_capacity * 3) // 4)
    vmem_limit = int(min(cap, max(32 * 1024 * 1024, need)))

    cost = pl.CostEstimate(
        flops=8 * n * c,
        transcendentals=n * c + 2 * n,
        bytes_accessed=n * c * itemsize + n * 4 + num_shards * 8 * 128 * 4,
    )

    partials = pl.pallas_call(
        kernel,
        out_shape=jax.ShapeDtypeStruct((num_shards, 8, 128), jnp.float32),
        grid_spec=pltpu.PrefetchScalarGridSpec(
            num_scalar_prefetch=0,
            grid=(num_shards, tiles_per_shard),
            in_specs=[
                pl.BlockSpec((tile_n, c), lambda p, t: (_block_idx(p, t), 0)),
                pl.BlockSpec((tile_n, 1), lambda p, t: (_block_idx(p, t), 0)),
            ],
            out_specs=pl.BlockSpec((1, 8, 128), lambda p, t: (p, 0, 0)),
        ),
        compiler_params=pltpu.CompilerParams(
            dimension_semantics=("parallel", "arbitrary"),
            vmem_limit_bytes=vmem_limit,
        ),
        cost_estimate=cost,
    )(logits, target2d)

    total = jnp.sum(partials[:, 0, 0])
    if size_average:
        total = total / jnp.float32(n)
    return total


def _focal_loss_ref(logits, target, *, gamma=0.0, size_average=True):
    logp = jax.nn.log_softmax(logits.astype(jnp.float32), axis=-1)
    logpt = jnp.take_along_axis(logp, target.reshape(-1, 1), axis=1).reshape(-1)
    pt = jnp.exp(logpt)
    loss = -1.0 * (1.0 - pt) ** gamma * logpt
    return jnp.mean(loss) if size_average else jnp.sum(loss)


if __name__ == "__main__":
    key = jax.random.PRNGKey(0)
    k1, k2, k3, k4, k5, k6 = jax.random.split(key, 6)

    # Test 1: single-tile path, integer gamma expansion, mean reduction.
    N, C = 8, 32
    logits = jax.random.normal(k1, (N, C), dtype=jnp.float32)
    target = jax.random.randint(k2, (N,), 0, C, dtype=jnp.int32)
    out = jax.block_until_ready(
        focal_loss(logits, target, gamma=2.0, size_average=True))
    ref = _focal_loss_ref(logits, target, gamma=2.0, size_average=True)
    assert jnp.allclose(out, ref, rtol=1e-5, atol=1e-5), (out, ref)

    # Test 2: multi-tile grid with ragged last tile, forced 2-shard parallel
    # axis (exercises the clamped-duplicate-tile skip), gamma=0, sum.
    N2, C2 = 37, 48
    logits2 = jax.random.normal(k3, (N2, C2), dtype=jnp.float32)
    target2 = jax.random.randint(k4, (N2,), 0, C2, dtype=jnp.int32)
    out2 = jax.block_until_ready(
        focal_loss(logits2, target2, gamma=0.0, size_average=False,
                   tile_n=8, num_shards=2))
    ref2 = _focal_loss_ref(logits2, target2, gamma=0.0, size_average=False)
    assert jnp.allclose(out2, ref2, rtol=1e-5, atol=1e-5), (out2, ref2)

    # Test 3: non-integer gamma fallback (w-clamp path), mean reduction.
    out3 = jax.block_until_ready(
        focal_loss(logits2, target2, gamma=1.5, size_average=True, tile_n=16))
    ref3 = _focal_loss_ref(logits2, target2, gamma=1.5, size_average=True)
    assert jnp.allclose(out3, ref3, rtol=1e-5, atol=1e-5), (out3, ref3)

    # Test 4: bf16 logits -> 16-row sublane alignment, ragged last tile.
    N4, C4 = 40, 32
    logits4 = jax.random.normal(k5, (N4, C4), dtype=jnp.bfloat16)
    target4 = jax.random.randint(k6, (N4,), 0, C4, dtype=jnp.int32)
    out4 = jax.block_until_ready(
        focal_loss(logits4, target4, gamma=2.0, size_average=True, tile_n=16))
    ref4 = _focal_loss_ref(logits4, target4, gamma=2.0, size_average=True)
    assert jnp.allclose(out4, ref4, rtol=2e-4, atol=2e-4), (out4, ref4)

    print("KERNEL_OK")
</pallas_src>

<mosaic_0001>
module attributes {stable_mosaic.version = 11 : i64} {
  func.func @_focal_loss_kernel(%arg0: i32, %arg1: i32, %arg2: memref<8x32xf32, #tpu.memory_space<vmem>>, %arg3: memref<8x1xi32, #tpu.memory_space<vmem>>, %arg4: memref<1x8x128xf32, #tpu.memory_space<vmem>>) attributes {dimension_semantics = [#tpu.dimension_semantics<parallel>, #tpu.dimension_semantics<arbitrary>], iteration_bounds = array<i64: 1, 1>, scalar_prefetch = 0 : i64, scratch_operands = 0 : i64, tpu.core_type = #tpu.core_type<tc>, window_params = [{transform_indices = @transform_0, window_bounds = array<i64: 8, 32>}, {transform_indices = @transform_1, window_bounds = array<i64: 8, 1>}, {transform_indices = @transform_2, window_bounds = array<i64: 1, 8, 128>}]} {
    %c1_i32 = arith.constant 1 : i32
    %0 = arith.muli %arg0, %c1_i32 : i32
    %1 = arith.addi %0, %arg1 : i32
    %c8_i32 = arith.constant 8 : i32
    %2 = arith.muli %1, %c8_i32 : i32
    %c0_i32 = arith.constant 0 : i32
    %3 = arith.cmpi eq, %arg1, %c0_i32 : i32
    %4 = arith.extui %3 : i1 to i32
    %c0_i32_0 = arith.constant 0 : i32
    %5 = arith.cmpi ne, %4, %c0_i32_0 : i32
    scf.if %5 {
      %cst = arith.constant 0.000000e+00 : f32
      %9 = vector.broadcast %cst : f32 to vector<1x8x128xf32>
      %c0 = arith.constant 0 : index
      %c0_3 = arith.constant 0 : index
      %c0_4 = arith.constant 0 : index
      %10 = vector.load %arg4[%c0, %c0_3, %c0_4] : memref<1x8x128xf32, #tpu.memory_space<vmem>>, vector<1x8x128xf32>
      tpu.vector_store %arg4[%c0, %c0_3, %c0_4], %9 {strides = array<i32>} : memref<1x8x128xf32, #tpu.memory_space<vmem>>, vector<1x8x128xf32>,
    } else {
    }
    %c8_i32_1 = arith.constant 8 : i32
    %6 = arith.cmpi slt, %2, %c8_i32_1 : i32
    %7 = arith.extui %6 : i1 to i32
    %c0_i32_2 = arith.constant 0 : i32
    %8 = arith.cmpi ne, %7, %c0_i32_2 : i32
    scf.if %8 {
      %c0 = arith.constant 0 : index
      %c0_3 = arith.constant 0 : index
      %9 = vector.load %arg2[%c0, %c0_3] : memref<8x32xf32, #tpu.memory_space<vmem>>, vector<8x32xf32>
      %c0_4 = arith.constant 0 : index
      %c0_5 = arith.constant 0 : index
      %10 = vector.load %arg3[%c0_4, %c0_5] : memref<8x1xi32, #tpu.memory_space<vmem>>, vector<8x1xi32>
      %11 = tpu.iota {dimensions = array<i32: 1>} : vector<1x32xi32>
      %12 = vector.broadcast %11 : vector<1x32xi32> to vector<8x32xi32>
      %13 = vector.broadcast %10 : vector<8x1xi32> to vector<8x32xi32>
      %14 = arith.cmpi eq, %12, %13 : vector<8x32xi32>
      %cst = arith.constant 0.000000e+00 : f32
      %15 = vector.broadcast %cst : f32 to vector<8x32xf32>
      %16 = arith.select %14, %9, %15 : vector<8x32xi1>, vector<8x32xf32>
      %cst_6 = arith.constant dense<0.000000e+00> : vector<8xf32>
      %17 = vector.multi_reduction <add>, %16, %cst_6 [1] : vector<8x32xf32> to vector<8xf32>
      %18 = vector.shape_cast %17 : vector<8xf32> to vector<8x1xf32>
      %cst_7 = arith.constant dense<0xFF800000> : vector<8xf32>
      %19 = vector.multi_reduction <maximumf>, %9, %cst_7 [1] : vector<8x32xf32> to vector<8xf32>
      %20 = vector.shape_cast %19 : vector<8xf32> to vector<8x1xf32>
      %21 = vector.broadcast %20 : vector<8x1xf32> to vector<8x32xf32>
      %22 = arith.subf %9, %21 : vector<8x32xf32>
      %23 = math.exp %22 : vector<8x32xf32>
      %cst_8 = arith.constant dense<0.000000e+00> : vector<8xf32>
      %24 = vector.multi_reduction <add>, %23, %cst_8 [1] : vector<8x32xf32> to vector<8xf32>
      %25 = vector.shape_cast %24 : vector<8xf32> to vector<8x1xf32>
      %26 = math.log %25 : vector<8x1xf32>
      %27 = arith.subf %18, %20 : vector<8x1xf32>
      %28 = arith.subf %27, %26 : vector<8x1xf32>
      %29 = math.exp %28 : vector<8x1xf32>
      %cst_9 = arith.constant 1.000000e+00 : f32
      %30 = vector.broadcast %cst_9 : f32 to vector<8x1xf32>
      %31 = arith.subf %30, %29 : vector<8x1xf32>
      %cst_10 = arith.constant 0.000000e+00 : f32
      %32 = vector.broadcast %cst_10 : f32 to vector<8x1xf32>
      %33 = arith.maximumf %31, %32 : vector<8x1xf32>
      %34 = arith.mulf %33, %33 : vector<8x1xf32>
      %cst_11 = arith.constant 0.000000e+00 : f32
      %35 = vector.broadcast %cst_11 : f32 to vector<8x1xf32>
      %36 = arith.subf %35, %34 : vector<8x1xf32>
      %37 = arith.mulf %36, %28 : vector<8x1xf32>
      %38 = tpu.iota {dimensions = array<i32: 0>} : vector<8x1xi32>
      %39 = vector.broadcast %2 : i32 to vector<8x1xi32>
      %40 = arith.addi %39, %38 : vector<8x1xi32>
      %c8_i32_12 = arith.constant 8 : i32
      %41 = vector.broadcast %c8_i32_12 : i32 to vector<8x1xi32>
      %42 = arith.cmpi slt, %40, %41 : vector<8x1xi32>
      %cst_13 = arith.constant 0.000000e+00 : f32
      %43 = vector.broadcast %cst_13 : f32 to vector<8x1xf32>
      %44 = arith.select %42, %37, %43 : vector<8x1xi1>, vector<8x1xf32>
      %c0_14 = arith.constant 0 : index
      %c0_15 = arith.constant 0 : index
      %c0_16 = arith.constant 0 : index
      %45 = vector.load %arg4[%c0_14, %c0_15, %c0_16] : memref<1x8x128xf32, #tpu.memory_space<vmem>>, vector<1x8x128xf32>
      %cst_17 = arith.constant dense<0.000000e+00> : vector<1xf32>
      %46 = vector.multi_reduction <add>, %44, %cst_17 [0] : vector<8x1xf32> to vector<1xf32>
      %47 = vector.shape_cast %46 : vector<1xf32> to vector<1x1xf32>
      %48 = vector.shape_cast %47 : vector<1x1xf32> to vector<1x1x1xf32>
      %49 = vector.broadcast %48 : vector<1x1x1xf32> to vector<1x8x128xf32>
      %50 = arith.addf %45, %49 : vector<1x8x128xf32>
      %c0_18 = arith.constant 0 : index
      %c0_19 = arith.constant 0 : index
      %c0_20 = arith.constant 0 : index
      %51 = vector.load %arg4[%c0_18, %c0_19, %c0_20] : memref<1x8x128xf32, #tpu.memory_space<vmem>>, vector<1x8x128xf32>
      tpu.vector_store %arg4[%c0_18, %c0_19, %c0_20], %50 {strides = array<i32>} : memref<1x8x128xf32, #tpu.memory_space<vmem>>, vector<1x8x128xf32>,
    } else {
    }
    return
  }
  func.func @transform_0(%arg0: i32, %arg1: i32) -> (i32, i32) {
    %c1_i32 = arith.constant 1 : i32
    %0 = arith.muli %arg0, %c1_i32 : i32
    %1 = arith.addi %0, %arg1 : i32
    %c0_i32 = arith.constant 0 : i32
    %2 = arith.minsi %1, %c0_i32 : i32
    %c0_i32_0 = arith.constant 0 : i32
    %c0_i32_1 = arith.constant 0 : i32
    return %2, %c0_i32_0 : i32, i32
  }
  func.func @transform_1(%arg0: i32, %arg1: i32) -> (i32, i32) {
    %c1_i32 = arith.constant 1 : i32
    %0 = arith.muli %arg0, %c1_i32 : i32
    %1 = arith.addi %0, %arg1 : i32
    %c0_i32 = arith.constant 0 : i32
    %2 = arith.minsi %1, %c0_i32 : i32
    %c0_i32_0 = arith.constant 0 : i32
    %c0_i32_1 = arith.constant 0 : i32
    return %2, %c0_i32_0 : i32, i32
  }
  func.func @transform_2(%arg0: i32, %arg1: i32) -> (i32, i32, i32) {
    %c0_i32 = arith.constant 0 : i32
    %c0_i32_0 = arith.constant 0 : i32
    %c0_i32_1 = arith.constant 0 : i32
    return %arg0, %c0_i32, %c0_i32_0 : i32, i32, i32
  }
}

</mosaic_0001>

<bundles_post_ra>
// kernel: tpu_custom_call.1
= control target key start
LH: loop header
LB: loop body
LE: loop exit
PB: predicated region body
PF: predicated region fallthrough
CT: control target
= control target key end

     0   :  { %vm86_vm0 = vcmask 261120   ;;  %s218_s0 = inlined_call_operand.vmem [shape: f32[8,32], index: 0, kind: input, shape index: {}]   ;;  %s219_s1 = inlined_call_operand.vmem [shape: s32[8,1], index: 1, kind: input, shape index: {}]   ;;  %s220_s2 = inlined_call_operand.hbm [shape: f32[1,8,128], index: 2, kind: output, shape index: {}]  }
   0x1   :  { %v77_v0 = vld [vmem:[%s218_s0] sm:$0xff] }
   0x2   :  { %7 = vsyncpa [#allocation3], 0  ;;  %v90_v1 = vsel %vm86_vm0, %v77_v0, -inf  ;;  %v189_v2 = vmov 0   ;;  %v78_v3 = vld [vmem:[%s219_s1] sm:$0xff]  ;;  %v79_v9 = vlaneseq  ;;  %s190_s0 = smov [#allocation2]  }
   0x3   :  { %156 = vset.pattern.permute.xlu0 %v189_v2  ;;  %s130_s1 = sshll.u32 %s190_s0, 4  ;;  %s132_s15 = sshll.u32 %s220_s2, 4  ;;  %s131_s1 = int_to_ptr.vmem [resolvable:$true] %s130_s1  ;;  %s133_s15 = int_to_ptr.hbm [resolvable:$true] %s132_s15 }
   0x4   :  { %91 = vmax.xlane.f32.xlu0 %v90_v1  ;;  %v80_v10 = vand.u32 127, %v79_v9 }
  0x18   :  { %82 = vperm.xlu0 %156, %v78_v3  }
  0x77   :  { %v92_v4 = vpop.xlane.xlu0 %91 }
  0x78   :  { %v93_v5 = vsub.f32 %v77_v0, %v92_v4 }
  0x7a   :  { %v94_v6 = vmul.f32 1.442695, %v93_v5 }
  0x7c   :  { %157 = vpow2.f32 %v94_v6 }
  0x82   :  { %v158_v7 = vpop.eup %157 }
  0x83   :  { %v96_v8 = vsel %vm86_vm0, %v158_v7, 0.0 }
  0x84   :  { %97 = vadd.xlane.f32.xlu1 %v96_v8 }
  0x8a   :  { %v83_v11 = vpop.permute.xlu0 %82 }
  0x8b   :  { %vm84_vm1 = vcmp.eq.s32.totalorder %v80_v10, %v83_v11 }
  0x8c   :  { %v85_v12 = vsel %vm84_vm1, %v77_v0, 0.0 }
  0x8d   :  { %v87_v13 = vsel %vm86_vm0, %v85_v12, 0.0 }
  0x8e   :  { %88 = vadd.xlane.f32.xlu1 %v87_v13 }
  0xf7   :  { %v98_v14 = vpop.xlane.xlu1 %97 }
  0xf8   :  { %159 = vlog2.f32 %v98_v14 }
  0xfe   :  { %v160_v15 = vpop.eup %159 }
  0xff   :  { %v100_v17 = vmul.f32 0.6931472, %v160_v15 }
 0x101   :  { %v89_v16 = vpop.xlane.xlu1 %88 }
 0x102   :  { %v101_v18 = vsub.f32 %v89_v16, %v92_v4 }
 0x104   :  { %v102_v19 = vsub.f32 %v101_v18, %v100_v17 }
 0x106   :  { %v103_v20 = vmul.f32 1.442695, %v102_v19 }
 0x108   :  { %161 = vpow2.f32 %v103_v20 }
 0x10e   :  { %v162_v21 = vpop.eup %161 }
 0x10f   :  { %v105_v22 = vsub.f32 1.0, %v162_v21 }
 0x111   :  { %v106_v23 = vmax.f32 %v105_v22, 0.0 }
 0x113   :  { %v107_v24 = vmul.f32 %v106_v23, %v106_v23 }
 0x115   :  { %v108_v25 = vsub.f32 0.0, %v107_v24 }
 0x117   :  { %v109_v26 = vmul.f32 %v108_v25, %v102_v19 }
 0x119   :  { %v117_v27 = vrot.slane %v109_v26, 4 }
 0x11b   :  { %v118_v28 = vadd.f32 %v117_v27, %v109_v26 }
 0x11d   :  { %v119_v29 = vrot.slane %v118_v28, 2 }
 0x11f   :  { %v120_v30 = vadd.f32 %v119_v29, %v118_v28 }
 0x121   :  { %v121_v31 = vrot.slane %v120_v30, 1 }
 0x123   :  { %v122_v32 = vadd.f32 %v121_v31, %v120_v30 }
 0x125   :  { %124 = vst [vmem:[#allocation2] sm:$0xff] %v122_v32 }
 0x126   :  { %135 = dma.vmem_to_hbm [thread:$0]  %s131_s1, 128, %s133_s15, [#allocation3]  }
 0x127   :  { %187 = dma.done.wait [#allocation3], 128  }
 0x128   :  { %188 = vsyncadd [#allocation3], 4294967168 }
 0x129   :  { %140 = vsyncpa [#allocation3], 1 }

</bundles_post_ra>
